<compile_context>
chip_gen: v6e
topology: v6e:2x2x1
jax: 0.10.0
libtpu: 0.0.40
codegen_flags: <defaults>
</compile_context>

<pallas_src>
import functools

import jax
import jax.numpy as jnp
from jax.experimental import pallas as pl
from jax.experimental.pallas import tpu as pltpu

A_DIM = 205
L_DIM = 768
V_DIM = 640

A_DIM_PAD = 256          # A_DIM rounded up to a lane-friendly multiple of 128
LN_EPS = 1e-5            # PyTorch nn.LayerNorm default


def _round_up(x, m):
    return (x + m - 1) // m * m


def _fused_kernel(l_ref, v_ref, a_ref, wl_ref, wv_ref, wa_ref, g_ref, b_ref,
                  ol_ref, ov_ref, oa_ref, *, dim):
    """For each branch: y = LayerNorm(x @ w) * gamma + beta (norm over `dim`)."""
    dim_pad = g_ref.shape[-1]
    lane = jax.lax.broadcasted_iota(jnp.int32, (1, dim_pad), 1)
    mask = (lane < dim).astype(jnp.float32)      # 1 on real features, 0 on pad
    inv_dim = jnp.float32(1.0 / dim)
    g = g_ref[...]                                # (1, dim_pad), f32, hoisted
    b = b_ref[...]

    def project_norm(x_ref, w_ref, o_ref):
        # MXU matmul; f32 accumulation regardless of operand dtype.
        y = jnp.dot(x_ref[...], w_ref[...], preferred_element_type=jnp.float32)
        # Padded output columns are exactly zero (zero weight columns), so the
        # plain sum already reduces over only the real `dim` features.
        mean = jnp.sum(y, axis=-1, keepdims=True) * inv_dim
        centered = (y - mean) * mask              # kill -mean in padded lanes
        var = jnp.sum(centered * centered, axis=-1, keepdims=True) * inv_dim
        y_hat = centered * jax.lax.rsqrt(var + LN_EPS)
        o_ref[...] = (y_hat * g + b).astype(o_ref.dtype)

    project_norm(l_ref, wl_ref, ol_ref)
    project_norm(v_ref, wv_ref, ov_ref)
    project_norm(a_ref, wa_ref, oa_ref)


def _pick_tm(k_total, dim_pad, in_bytes, budget=12 << 20):
    """Largest power-of-two row tile whose pipeline footprint fits the budget."""
    def vmem(tm):
        return (2 * tm * k_total * in_bytes            # double-buffered activations
                + 2 * tm * 3 * dim_pad * 4             # double-buffered f32 outputs
                + 2 * k_total * dim_pad * in_bytes     # weights (resident)
                + 2 * 2 * dim_pad * 4)                 # gamma / beta
    tm = 512
    while tm > 8 and vmem(tm) > budget:
        tm //= 2
    return tm


def unify_dimension_forward(l, v, a, wl_pad, wv_pad, wa_pad, g_pad, b_pad, *,
                            dim, compute_dtype):
    """l/v/a: (B, S, K) f32; *_pad: pre-padded kernel weights; returns 3x (B,S,dim)."""
    B, S, _ = l.shape
    M = B * S
    dim_pad = g_pad.shape[-1]
    k_total = L_DIM + V_DIM + A_DIM_PAD
    in_bytes = jnp.dtype(compute_dtype).itemsize

    m_pad8 = _round_up(M, 8)
    tm = min(_pick_tm(k_total, dim_pad, in_bytes), m_pad8)
    m_pad = _round_up(M, tm)
    grid = (m_pad // tm,)

    def prep(x, k_real, k_pad):
        x2 = x.reshape(M, k_real).astype(compute_dtype)
        return jnp.pad(x2, ((0, m_pad - M), (0, k_pad - k_real)))

    l2 = prep(l, L_DIM, L_DIM)
    v2 = prep(v, V_DIM, V_DIM)
    a2 = prep(a, A_DIM, A_DIM_PAD)      # 205 -> 256, exact (zero padding)

    def row_spec(k):
        return pl.BlockSpec((tm, k), lambda i: (i, 0))

    def resident_spec(shape):
        return pl.BlockSpec(shape, lambda i: (0, 0))   # DMA'd once, stays in VMEM

    out_sds = jax.ShapeDtypeStruct((m_pad, dim_pad), jnp.float32)
    out_spec = pl.BlockSpec((tm, dim_pad), lambda i: (i, 0))

    out_l, out_v, out_a = pl.pallas_call(
        functools.partial(_fused_kernel, dim=dim),
        out_shape=(out_sds, out_sds, out_sds),
        grid=grid,
        in_specs=[
            row_spec(L_DIM), row_spec(V_DIM), row_spec(A_DIM_PAD),
            resident_spec((L_DIM, dim_pad)),
            resident_spec((V_DIM, dim_pad)),
            resident_spec((A_DIM_PAD, dim_pad)),
            resident_spec((1, dim_pad)),
            resident_spec((1, dim_pad)),
        ],
        out_specs=(out_spec, out_spec, out_spec),
        compiler_params=pltpu.CompilerParams(
            dimension_semantics=("parallel",)),
    )(l2, v2, a2, wl_pad, wv_pad, wa_pad, g_pad, b_pad)

    def crop(o):
        return o[:M, :dim].reshape(B, S, dim)

    return crop(out_l), crop(out_v), crop(out_a)


class UnifyDimensionPallas:
    """Deterministic, in-script re-implementation of Unify_Dimension."""

    def __init__(self, dim, key, compute_dtype=jnp.bfloat16):
        self.dim = dim
        self.dim_pad = _round_up(max(dim, 128), 128)
        self.compute_dtype = compute_dtype
        k_l, k_v, k_a = jax.random.split(key, 3)

        # nn.Linear stores weight as (out, in); we keep (in, out) for x @ W.
        def init_w(k, fan_in, fan_out):
            bound = 1.0 / jnp.sqrt(fan_in)
            return jax.random.uniform(
                k, (fan_in, fan_out), jnp.float32, minval=-bound, maxval=bound)

        # Reference-semantics (unpadded, f32) parameters.
        self.w_l = init_w(k_l, L_DIM, dim)
        self.w_v = init_w(k_v, V_DIM, dim)
        self.w_a = init_w(k_a, A_DIM, dim)
        self.gamma = jnp.ones((dim,), jnp.float32)   # shared norm1 (default init)
        self.beta = jnp.zeros((dim,), jnp.float32)

        # Kernel-side parameters: padded ONCE here (outside the kernel) and
        # pre-cast to the MXU operand dtype.
        def pad_w(w, k_pad):
            return jnp.pad(
                w, ((0, k_pad - w.shape[0]), (0, self.dim_pad - w.shape[1]))
            ).astype(compute_dtype)

        self.w_l_k = pad_w(self.w_l, L_DIM)
        self.w_v_k = pad_w(self.w_v, V_DIM)
        self.w_a_k = pad_w(self.w_a, A_DIM_PAD)
        self.g_k = jnp.pad(self.gamma, (0, self.dim_pad - dim)).reshape(1, -1)
        self.b_k = jnp.pad(self.beta, (0, self.dim_pad - dim)).reshape(1, -1)

    def __call__(self, l, v, a):
        return unify_dimension_forward(
            l, v, a, self.w_l_k, self.w_v_k, self.w_a_k, self.g_k, self.b_k,
            dim=self.dim, compute_dtype=self.compute_dtype)


def _reference(x, w, gamma, beta, compute_dtype=None):
    """Plain-JAX reference; optionally mimics the bf16-operand MXU path."""
    if compute_dtype is not None:
        x = x.astype(compute_dtype)
        w = w.astype(compute_dtype)
    y = jnp.einsum("bsk,kd->bsd", x, w, preferred_element_type=jnp.float32)
    mean = jnp.mean(y, axis=-1, keepdims=True)
    var = jnp.mean((y - mean) ** 2, axis=-1, keepdims=True)
    return (y - mean) * jax.lax.rsqrt(var + LN_EPS) * gamma + beta


if __name__ == "__main__":
    B, S, DIM = 2, 8, 32
    key = jax.random.PRNGKey(0)
    k_mod, k_l, k_v, k_a = jax.random.split(key, 4)

    l = jax.random.normal(k_l, (B, S, L_DIM), jnp.float32)
    v = jax.random.normal(k_v, (B, S, V_DIM), jnp.float32)
    a = jax.random.normal(k_a, (B, S, A_DIM), jnp.float32)

    # 1) Exact-semantics path (f32 MXU operands): tight check vs PyTorch math.
    mod_f32 = UnifyDimensionPallas(DIM, k_mod, compute_dtype=jnp.float32)
    out_l, out_v, out_a = mod_f32(l, v, a)
    jax.block_until_ready((out_l, out_v, out_a))
    for out, x, w in ((out_l, l, mod_f32.w_l),
                      (out_v, v, mod_f32.w_v),
                      (out_a, a, mod_f32.w_a)):
        ref = _reference(x, w, mod_f32.gamma, mod_f32.beta)
        assert out.shape == (B, S, DIM)
        assert jnp.allclose(out, ref, atol=1e-4, rtol=1e-4), float(
            jnp.max(jnp.abs(out - ref)))

    # 2) Fast path (bf16 MXU operands, f32 accumulation + f32 LayerNorm):
    #    check vs a bf16-operand reference with the same accumulation dtype.
    mod_bf16 = UnifyDimensionPallas(DIM, k_mod, compute_dtype=jnp.bfloat16)
    out_l, out_v, out_a = mod_bf16(l, v, a)
    jax.block_until_ready((out_l, out_v, out_a))
    for out, x, w in ((out_l, l, mod_bf16.w_l),
                      (out_v, v, mod_bf16.w_v),
                      (out_a, a, mod_bf16.w_a)):
        ref = _reference(x, w, mod_bf16.gamma, mod_bf16.beta,
                         compute_dtype=jnp.bfloat16)
        assert out.shape == (B, S, DIM)
        assert jnp.allclose(out, ref, atol=2e-3, rtol=2e-3), float(
            jnp.max(jnp.abs(out - ref)))

    print("KERNEL_OK")
</pallas_src>

<mosaic_0001>
module attributes {stable_mosaic.version = 11 : i64} {
  func.func @_fused_kernel(%arg0: i32, %arg1: memref<16x768xf32, #tpu.memory_space<vmem>>, %arg2: memref<16x640xf32, #tpu.memory_space<vmem>>, %arg3: memref<16x256xf32, #tpu.memory_space<vmem>>, %arg4: memref<768x128xf32, #tpu.memory_space<vmem>>, %arg5: memref<640x128xf32, #tpu.memory_space<vmem>>, %arg6: memref<256x128xf32, #tpu.memory_space<vmem>>, %arg7: memref<1x128xf32, #tpu.memory_space<vmem>>, %arg8: memref<1x128xf32, #tpu.memory_space<vmem>>, %arg9: memref<16x128xf32, #tpu.memory_space<vmem>>, %arg10: memref<16x128xf32, #tpu.memory_space<vmem>>, %arg11: memref<16x128xf32, #tpu.memory_space<vmem>>) attributes {dimension_semantics = [#tpu.dimension_semantics<parallel>], iteration_bounds = array<i64: 1>, scalar_prefetch = 0 : i64, scratch_operands = 0 : i64, tpu.core_type = #tpu.core_type<tc>, window_params = [{transform_indices = @transform_0, window_bounds = array<i64: 16, 768>}, {transform_indices = @transform_1, window_bounds = array<i64: 16, 640>}, {transform_indices = @transform_2, window_bounds = array<i64: 16, 256>}, {pipeline_mode = #tpu.pipeline_mode<synchronous>, transform_indices = @transform_3, window_bounds = array<i64: 768, 128>}, {pipeline_mode = #tpu.pipeline_mode<synchronous>, transform_indices = @transform_4, window_bounds = array<i64: 640, 128>}, {pipeline_mode = #tpu.pipeline_mode<synchronous>, transform_indices = @transform_5, window_bounds = array<i64: 256, 128>}, {pipeline_mode = #tpu.pipeline_mode<synchronous>, transform_indices = @transform_6, window_bounds = array<i64: 1, 128>}, {pipeline_mode = #tpu.pipeline_mode<synchronous>, transform_indices = @transform_7, window_bounds = array<i64: 1, 128>}, {transform_indices = @transform_8, window_bounds = array<i64: 16, 128>}, {transform_indices = @transform_9, window_bounds = array<i64: 16, 128>}, {transform_indices = @transform_10, window_bounds = array<i64: 16, 128>}]} {
    %0 = tpu.iota {dimensions = array<i32: 1>} : vector<1x128xi32>
    %c32_i32 = arith.constant 32 : i32
    %1 = vector.broadcast %c32_i32 : i32 to vector<1x128xi32>
    %2 = arith.cmpi slt, %0, %1 : vector<1x128xi32>
    %3 = arith.extui %2 : vector<1x128xi1> to vector<1x128xi32>
    %4 = arith.sitofp %3 : vector<1x128xi32> to vector<1x128xf32>
    %c0 = arith.constant 0 : index
    %c0_0 = arith.constant 0 : index
    %5 = vector.load %arg7[%c0, %c0_0] : memref<1x128xf32, #tpu.memory_space<vmem>>, vector<1x128xf32>
    %c0_1 = arith.constant 0 : index
    %c0_2 = arith.constant 0 : index
    %6 = vector.load %arg8[%c0_1, %c0_2] : memref<1x128xf32, #tpu.memory_space<vmem>>, vector<1x128xf32>
    %c0_3 = arith.constant 0 : index
    %c0_4 = arith.constant 0 : index
    %7 = vector.load %arg1[%c0_3, %c0_4] : memref<16x768xf32, #tpu.memory_space<vmem>>, vector<16x768xf32>
    %c0_5 = arith.constant 0 : index
    %c0_6 = arith.constant 0 : index
    %8 = vector.load %arg4[%c0_5, %c0_6] : memref<768x128xf32, #tpu.memory_space<vmem>>, vector<768x128xf32>
    %cst = arith.constant dense<0.000000e+00> : vector<16x128xf32>
    %9 = tpu.matmul %7, %8, %cst {dimension_numbers = #tpu.dot_dimension_numbers<[1], [0], [0], [1], [0, 0, 1, 1], [], []>} : vector<16x768xf32>, vector<768x128xf32>, vector<16x128xf32> -> vector<16x128xf32>
    %cst_7 = arith.constant dense<0.000000e+00> : vector<16xf32>
    %10 = vector.multi_reduction <add>, %9, %cst_7 [1] : vector<16x128xf32> to vector<16xf32>
    %11 = vector.shape_cast %10 : vector<16xf32> to vector<16x1xf32>
    %cst_8 = arith.constant 3.125000e-02 : f32
    %12 = vector.broadcast %cst_8 : f32 to vector<16x1xf32>
    %13 = arith.mulf %11, %12 : vector<16x1xf32>
    %14 = vector.broadcast %13 : vector<16x1xf32> to vector<16x128xf32>
    %15 = arith.subf %9, %14 : vector<16x128xf32>
    %16 = vector.broadcast %4 : vector<1x128xf32> to vector<16x128xf32>
    %17 = arith.mulf %15, %16 : vector<16x128xf32>
    %18 = arith.mulf %17, %17 : vector<16x128xf32>
    %cst_9 = arith.constant dense<0.000000e+00> : vector<16xf32>
    %19 = vector.multi_reduction <add>, %18, %cst_9 [1] : vector<16x128xf32> to vector<16xf32>
    %20 = vector.shape_cast %19 : vector<16xf32> to vector<16x1xf32>
    %cst_10 = arith.constant 3.125000e-02 : f32
    %21 = vector.broadcast %cst_10 : f32 to vector<16x1xf32>
    %22 = arith.mulf %20, %21 : vector<16x1xf32>
    %cst_11 = arith.constant 9.99999974E-6 : f32
    %23 = vector.broadcast %cst_11 : f32 to vector<16x1xf32>
    %24 = arith.addf %22, %23 : vector<16x1xf32>
    %25 = math.rsqrt %24 : vector<16x1xf32>
    %26 = vector.broadcast %25 : vector<16x1xf32> to vector<16x128xf32>
    %27 = arith.mulf %17, %26 : vector<16x128xf32>
    %28 = vector.broadcast %5 : vector<1x128xf32> to vector<16x128xf32>
    %29 = arith.mulf %27, %28 : vector<16x128xf32>
    %30 = vector.broadcast %6 : vector<1x128xf32> to vector<16x128xf32>
    %31 = arith.addf %29, %30 : vector<16x128xf32>
    %c0_12 = arith.constant 0 : index
    %c0_13 = arith.constant 0 : index
    %32 = vector.load %arg9[%c0_12, %c0_13] : memref<16x128xf32, #tpu.memory_space<vmem>>, vector<16x128xf32>
    tpu.vector_store %arg9[%c0_12, %c0_13], %31 {strides = array<i32>} : memref<16x128xf32, #tpu.memory_space<vmem>>, vector<16x128xf32>,
    %c0_14 = arith.constant 0 : index
    %c0_15 = arith.constant 0 : index
    %33 = vector.load %arg2[%c0_14, %c0_15] : memref<16x640xf32, #tpu.memory_space<vmem>>, vector<16x640xf32>
    %c0_16 = arith.constant 0 : index
    %c0_17 = arith.constant 0 : index
    %34 = vector.load %arg5[%c0_16, %c0_17] : memref<640x128xf32, #tpu.memory_space<vmem>>, vector<640x128xf32>
    %cst_18 = arith.constant dense<0.000000e+00> : vector<16x128xf32>
    %35 = tpu.matmul %33, %34, %cst_18 {dimension_numbers = #tpu.dot_dimension_numbers<[1], [0], [0], [1], [0, 0, 1, 1], [], []>} : vector<16x640xf32>, vector<640x128xf32>, vector<16x128xf32> -> vector<16x128xf32>
    %cst_19 = arith.constant dense<0.000000e+00> : vector<16xf32>
    %36 = vector.multi_reduction <add>, %35, %cst_19 [1] : vector<16x128xf32> to vector<16xf32>
    %37 = vector.shape_cast %36 : vector<16xf32> to vector<16x1xf32>
    %cst_20 = arith.constant 3.125000e-02 : f32
    %38 = vector.broadcast %cst_20 : f32 to vector<16x1xf32>
    %39 = arith.mulf %37, %38 : vector<16x1xf32>
    %40 = vector.broadcast %39 : vector<16x1xf32> to vector<16x128xf32>
    %41 = arith.subf %35, %40 : vector<16x128xf32>
    %42 = vector.broadcast %4 : vector<1x128xf32> to vector<16x128xf32>
    %43 = arith.mulf %41, %42 : vector<16x128xf32>
    %44 = arith.mulf %43, %43 : vector<16x128xf32>
    %cst_21 = arith.constant dense<0.000000e+00> : vector<16xf32>
    %45 = vector.multi_reduction <add>, %44, %cst_21 [1] : vector<16x128xf32> to vector<16xf32>
    %46 = vector.shape_cast %45 : vector<16xf32> to vector<16x1xf32>
    %cst_22 = arith.constant 3.125000e-02 : f32
    %47 = vector.broadcast %cst_22 : f32 to vector<16x1xf32>
    %48 = arith.mulf %46, %47 : vector<16x1xf32>
    %cst_23 = arith.constant 9.99999974E-6 : f32
    %49 = vector.broadcast %cst_23 : f32 to vector<16x1xf32>
    %50 = arith.addf %48, %49 : vector<16x1xf32>
    %51 = math.rsqrt %50 : vector<16x1xf32>
    %52 = vector.broadcast %51 : vector<16x1xf32> to vector<16x128xf32>
    %53 = arith.mulf %43, %52 : vector<16x128xf32>
    %54 = vector.broadcast %5 : vector<1x128xf32> to vector<16x128xf32>
    %55 = arith.mulf %53, %54 : vector<16x128xf32>
    %56 = vector.broadcast %6 : vector<1x128xf32> to vector<16x128xf32>
    %57 = arith.addf %55, %56 : vector<16x128xf32>
    %c0_24 = arith.constant 0 : index
    %c0_25 = arith.constant 0 : index
    %58 = vector.load %arg10[%c0_24, %c0_25] : memref<16x128xf32, #tpu.memory_space<vmem>>, vector<16x128xf32>
    tpu.vector_store %arg10[%c0_24, %c0_25], %57 {strides = array<i32>} : memref<16x128xf32, #tpu.memory_space<vmem>>, vector<16x128xf32>,
    %c0_26 = arith.constant 0 : index
    %c0_27 = arith.constant 0 : index
    %59 = vector.load %arg3[%c0_26, %c0_27] : memref<16x256xf32, #tpu.memory_space<vmem>>, vector<16x256xf32>
    %c0_28 = arith.constant 0 : index
    %c0_29 = arith.constant 0 : index
    %60 = vector.load %arg6[%c0_28, %c0_29] : memref<256x128xf32, #tpu.memory_space<vmem>>, vector<256x128xf32>
    %cst_30 = arith.constant dense<0.000000e+00> : vector<16x128xf32>
    %61 = tpu.matmul %59, %60, %cst_30 {dimension_numbers = #tpu.dot_dimension_numbers<[1], [0], [0], [1], [0, 0, 1, 1], [], []>} : vector<16x256xf32>, vector<256x128xf32>, vector<16x128xf32> -> vector<16x128xf32>
    %cst_31 = arith.constant dense<0.000000e+00> : vector<16xf32>
    %62 = vector.multi_reduction <add>, %61, %cst_31 [1] : vector<16x128xf32> to vector<16xf32>
    %63 = vector.shape_cast %62 : vector<16xf32> to vector<16x1xf32>
    %cst_32 = arith.constant 3.125000e-02 : f32
    %64 = vector.broadcast %cst_32 : f32 to vector<16x1xf32>
    %65 = arith.mulf %63, %64 : vector<16x1xf32>
    %66 = vector.broadcast %65 : vector<16x1xf32> to vector<16x128xf32>
    %67 = arith.subf %61, %66 : vector<16x128xf32>
    %68 = vector.broadcast %4 : vector<1x128xf32> to vector<16x128xf32>
    %69 = arith.mulf %67, %68 : vector<16x128xf32>
    %70 = arith.mulf %69, %69 : vector<16x128xf32>
    %cst_33 = arith.constant dense<0.000000e+00> : vector<16xf32>
    %71 = vector.multi_reduction <add>, %70, %cst_33 [1] : vector<16x128xf32> to vector<16xf32>
    %72 = vector.shape_cast %71 : vector<16xf32> to vector<16x1xf32>
    %cst_34 = arith.constant 3.125000e-02 : f32
    %73 = vector.broadcast %cst_34 : f32 to vector<16x1xf32>
    %74 = arith.mulf %72, %73 : vector<16x1xf32>
    %cst_35 = arith.constant 9.99999974E-6 : f32
    %75 = vector.broadcast %cst_35 : f32 to vector<16x1xf32>
    %76 = arith.addf %74, %75 : vector<16x1xf32>
    %77 = math.rsqrt %76 : vector<16x1xf32>
    %78 = vector.broadcast %77 : vector<16x1xf32> to vector<16x128xf32>
    %79 = arith.mulf %69, %78 : vector<16x128xf32>
    %80 = vector.broadcast %5 : vector<1x128xf32> to vector<16x128xf32>
    %81 = arith.mulf %79, %80 : vector<16x128xf32>
    %82 = vector.broadcast %6 : vector<1x128xf32> to vector<16x128xf32>
    %83 = arith.addf %81, %82 : vector<16x128xf32>
    %c0_36 = arith.constant 0 : index
    %c0_37 = arith.constant 0 : index
    %84 = vector.load %arg11[%c0_36, %c0_37] : memref<16x128xf32, #tpu.memory_space<vmem>>, vector<16x128xf32>
    tpu.vector_store %arg11[%c0_36, %c0_37], %83 {strides = array<i32>} : memref<16x128xf32, #tpu.memory_space<vmem>>, vector<16x128xf32>,
    return
  }
  func.func @transform_0(%arg0: i32) -> (i32, i32) {
    %c0_i32 = arith.constant 0 : i32
    %c0_i32_0 = arith.constant 0 : i32
    return %arg0, %c0_i32 : i32, i32
  }
  func.func @transform_1(%arg0: i32) -> (i32, i32) {
    %c0_i32 = arith.constant 0 : i32
    %c0_i32_0 = arith.constant 0 : i32
    return %arg0, %c0_i32 : i32, i32
  }
  func.func @transform_2(%arg0: i32) -> (i32, i32) {
    %c0_i32 = arith.constant 0 : i32
    %c0_i32_0 = arith.constant 0 : i32
    return %arg0, %c0_i32 : i32, i32
  }
  func.func @transform_3(%arg0: i32) -> (i32, i32) {
    %c0_i32 = arith.constant 0 : i32
    %c0_i32_0 = arith.constant 0 : i32
    %c0_i32_1 = arith.constant 0 : i32
    return %c0_i32, %c0_i32_0 : i32, i32
  }
  func.func @transform_4(%arg0: i32) -> (i32, i32) {
    %c0_i32 = arith.constant 0 : i32
    %c0_i32_0 = arith.constant 0 : i32
    %c0_i32_1 = arith.constant 0 : i32
    return %c0_i32, %c0_i32_0 : i32, i32
  }
  func.func @transform_5(%arg0: i32) -> (i32, i32) {
    %c0_i32 = arith.constant 0 : i32
    %c0_i32_0 = arith.constant 0 : i32
    %c0_i32_1 = arith.constant 0 : i32
    return %c0_i32, %c0_i32_0 : i32, i32
  }
  func.func @transform_6(%arg0: i32) -> (i32, i32) {
    %c0_i32 = arith.constant 0 : i32
    %c0_i32_0 = arith.constant 0 : i32
    %c0_i32_1 = arith.constant 0 : i32
    return %c0_i32, %c0_i32_0 : i32, i32
  }
  func.func @transform_7(%arg0: i32) -> (i32, i32) {
    %c0_i32 = arith.constant 0 : i32
    %c0_i32_0 = arith.constant 0 : i32
    %c0_i32_1 = arith.constant 0 : i32
    return %c0_i32, %c0_i32_0 : i32, i32
  }
  func.func @transform_8(%arg0: i32) -> (i32, i32) {
    %c0_i32 = arith.constant 0 : i32
    %c0_i32_0 = arith.constant 0 : i32
    return %arg0, %c0_i32 : i32, i32
  }
  func.func @transform_9(%arg0: i32) -> (i32, i32) {
    %c0_i32 = arith.constant 0 : i32
    %c0_i32_0 = arith.constant 0 : i32
    return %arg0, %c0_i32 : i32, i32
  }
  func.func @transform_10(%arg0: i32) -> (i32, i32) {
    %c0_i32 = arith.constant 0 : i32
    %c0_i32_0 = arith.constant 0 : i32
    return %arg0, %c0_i32 : i32, i32
  }
}

</mosaic_0001>

<bundles_post_ra>
// kernel: tpu_custom_call.1
= control target key start
LH: loop header
LB: loop body
LE: loop exit
PB: predicated region body
PF: predicated region fallthrough
CT: control target
= control target key end

     0   :  { %16 = vsyncpa [#allocation3], 0  ;;  %s1688_s0 = inlined_call_operand.hbm [shape: f32[16,768], index: 0, kind: input, shape index: {}]   ;;  %s1689_s1 = inlined_call_operand.hbm [shape: f32[16,640], index: 1, kind: input, shape index: {}]   ;;  %s1690_s2 = inlined_call_operand.hbm [shape: f32[16,256], index: 2, kind: input, shape index: {}]   ;;  %s1691_s3 = inlined_call_operand.hbm [shape: f32[768,128], index: 3, kind: input, shape index: {}]   ;;  %s1692_s4 = inlined_call_operand.hbm [shape: f32[640,128], index: 4, kind: input, shape index: {}]   ;;  %s1693_s5 = inlined_call_operand.hbm [shape: f32[256,128], index: 5, kind: input, shape index: {}]   ;;  %s1694_s6 = inlined_call_operand.vmem [shape: f32[1,128], index: 6, kind: input, shape index: {}]   ;;  %s1695_s7 = inlined_call_operand.vmem [shape: f32[1,128], index: 7, kind: input, shape index: {}]   ;;  %s1696_s8 = inlined_call_operand.hbm [shape: f32[16,128], index: 8, kind: output, shape index: {0}]   ;;  %s1697_s9 = inlined_call_operand.hbm [shape: f32[16,128], index: 9, kind: output, shape index: {1}]   ;;  %s1698_s10 = inlined_call_operand.hbm [shape: f32[16,128], index: 10, kind: output, shape index: {2}]  }
   0x1   :  { %17 = vsyncpa [#allocation6], 0 }
   0x2   :  { %18 = vsyncpa [#allocation9], 0 }
   0x3   :  { %19 = vsyncpa [#allocation12], 0 }
   0x4   :  { %20 = vsyncpa [#allocation4], 0 }
   0x5   :  { %21 = vsyncpa [#allocation15], 0  ;;  %s1541_s13 = smov [#allocation5]  }
   0x6   :  { %s39_s14 = sshll.u32 %s1541_s13, 4  ;;  %s40_s14 = int_to_ptr.vmem [resolvable:$true] %s39_s14 }
   0x7   :  { %s1357_s15 = scalar_lea.vmem %s40_s14, 1280  ;;  %p1362_p1 = scmp.lt.s32.totalorder %s40_s14, %s40_s14 }
   0x8   :  { %p1358_p0 = scmp.ne.s32.totalorder %s40_s14, %s1357_s15  ;;  %p1363_p2 = scmp.lt.s32.totalorder %s1357_s15, %s1357_s15 }
   0xa   :  { %p1364_p3 = por %p1363_p2, %p1362_p1 }
   0xc   :  { %p1365_p4 = pnand %p1364_p3, %p1358_p0 }
   0xe   :  { %1368 = shalt.err (!%p1365_p4)
}
   0xf   :  { %s1542_s16 = smov 640   ;;  %s1543_s17 = smov 40  }
  0x10   :  { %45 = dma.hbm_to_vmem [thread:$0]  %s1689_s1, 1280, %s40_s14, [#allocation6], %s1542_s16, %s1542_s16, %s1543_s17  }
  0x11   :  { %s1544_s20 = smov [#allocation8]  }
  0x12   :  { %s63_s21 = sshll.u32 %s1544_s20, 4  ;;  %s64_s21 = int_to_ptr.vmem [resolvable:$true] %s63_s21 }
  0x13   :  { %s1377_s22 = scalar_lea.vmem %s64_s21, 12288  ;;  %p1382_p6 = scmp.lt.s32.totalorder %s64_s21, %s64_s21 }
  0x14   :  { %p1378_p5 = scmp.ne.s32.totalorder %s64_s21, %s1377_s22  ;;  %p1383_p7 = scmp.lt.s32.totalorder %s1377_s22, %s1377_s22 }
  0x16   :  { %p1384_p8 = por %p1383_p7, %p1382_p6 }
  0x18   :  { %p1385_p9 = pnand %p1384_p8, %p1378_p5 }
  0x1a   :  { %1388 = shalt.err (!%p1385_p9)
}
  0x1b   :  { %s1545_s23 = smov 128   ;;  %s1546_s24 = smov 8  }
  0x1c   :  { %69 = dma.hbm_to_vmem [thread:$0]  %s1691_s3, 12288, %s64_s21, [#allocation9], %s1545_s23, %s1545_s23, %s1546_s24  }
  0x1d   :  { %s1547_s1 = smov [#allocation2]  }
  0x1e   :  { %s27_s27 = sshll.u32 %s1547_s1, 4  ;;  %s28_s27 = int_to_ptr.vmem [resolvable:$true] %s27_s27 }
  0x1f   :  { %s1397_s28 = scalar_lea.vmem %s28_s27, 1536  ;;  %p1402_p11 = scmp.lt.s32.totalorder %s28_s27, %s28_s27 }
  0x20   :  { %p1398_p10 = scmp.ne.s32.totalorder %s28_s27, %s1397_s28  ;;  %p1403_p12 = scmp.lt.s32.totalorder %s1397_s28, %s1397_s28 }
  0x22   :  { %p1404_p13 = por %p1403_p12, %p1402_p11 }
  0x24   :  { %p1405_p0 = pnand %p1404_p13, %p1398_p10 }
  0x26   :  { %1408 = shalt.err (!%p1405_p0)
}
  0x27   :  { %s1548_s29 = smov 768   ;;  %s1549_s30 = smov 48  }
  0x28   :  { %33 = dma.hbm_to_vmem [thread:$0]  %s1688_s0, 1536, %s28_s27, [#allocation3], %s1548_s29, %s1548_s29, %s1549_s30  }
  0x29   :  { %s1550_s13 = smov [#allocation7]  }
  0x2a   :  { %s51_s14 = sshll.u32 %s1550_s13, 4  ;;  %s52_s14 = int_to_ptr.vmem [resolvable:$true] %s51_s14 }
  0x2b   :  { %s1417_s3 = scalar_lea.vmem %s52_s14, 512  ;;  %p1422_p2 = scmp.lt.s32.totalorder %s52_s14, %s52_s14 }
  0x2c   :  { %p1418_p1 = scmp.ne.s32.totalorder %s52_s14, %s1417_s3  ;;  %p1423_p3 = scmp.lt.s32.totalorder %s1417_s3, %s1417_s3 }
  0x2e   :  { %p1424_p4 = por %p1423_p3, %p1422_p2 }
  0x30   :  { %p1425_p5 = pnand %p1424_p4, %p1418_p1 }
  0x32   :  { %1428 = shalt.err (!%p1425_p5)
}
  0x33   :  { %s1551_s15 = smov 256   ;;  %s1552_s16 = smov 16  }
  0x34   :  { %57 = dma.hbm_to_vmem [thread:$0]  %s1690_s2, 512, %s52_s14, [#allocation6], %s1551_s15, %s1551_s15, %s1552_s16  }
  0x35   :  { %s1553_s19 = smov [#allocation10]   ;;  %s1554_s21 = smov [#allocation11]  }
  0x36   :  { %s75_s20 = sshll.u32 %s1553_s19, 4  ;;  %s87_s0 = sshll.u32 %s1554_s21, 4  ;;  %s76_s20 = int_to_ptr.vmem [resolvable:$true] %s75_s20  ;;  %s88_s0 = int_to_ptr.vmem [resolvable:$true] %s87_s0 }
  0x37   :  { %s1437_s22 = scalar_lea.vmem %s76_s20, 10240  ;;  %p1442_p7 = scmp.lt.s32.totalorder %s76_s20, %s76_s20 }
  0x38   :  { %p1438_p6 = scmp.ne.s32.totalorder %s76_s20, %s1437_s22  ;;  %p1443_p8 = scmp.lt.s32.totalorder %s1437_s22, %s1437_s22 }
  0x3a   :  { %p1444_p9 = por %p1443_p8, %p1442_p7 }
  0x3c   :  { %p1445_p10 = pnand %p1444_p9, %p1438_p6 }
  0x3e   :  { %1448 = shalt.err (!%p1445_p10)
}
  0x3f   :  { %81 = dma.hbm_to_vmem [thread:$0]  %s1692_s4, 10240, %s76_s20, [#allocation9], %s1545_s23, %s1545_s23, %s1546_s24  }
  0x40   :  { %s1457_s2 = scalar_lea.vmem %s88_s0, 4096  ;;  %p1462_p12 = scmp.lt.s32.totalorder %s88_s0, %s88_s0 }
  0x41   :  { %p1458_p11 = scmp.ne.s32.totalorder %s88_s0, %s1457_s2  ;;  %p1463_p13 = scmp.lt.s32.totalorder %s1457_s2, %s1457_s2 }
  0x43   :  { %p1464_p0 = por %p1463_p13, %p1462_p12 }
  0x45   :  { %p1465_p1 = pnand %p1464_p0, %p1458_p11 }
  0x47   :  { %1468 = shalt.err (!%p1465_p1)
}
  0x48   :  { %93 = dma.hbm_to_vmem [thread:$0]  %s1693_s5, 4096, %s88_s0, [#allocation12], %s1545_s23, %s1545_s23, %s1546_s24  }
  0x49   :  { %1529 = dma.done.wait [#allocation3], 1536  }
  0x4a   :  { %1530 = vsyncadd [#allocation3], 4294965760 }
  0x4b   :  { %1531 = dma.done.wait [#allocation6], 1792  }
  0x4c   :  { %1532 = vsyncadd [#allocation6], 4294965504 }
  0x4d   :  { %1533 = dma.done.wait [#allocation9], 22528  }
  0x4e   :  { %1534 = vsyncadd [#allocation9], 4294944768 }
  0x4f   :  { %1535 = dma.done.wait [#allocation12], 4096  }
  0x50   :  { %1536 = vsyncadd [#allocation12], 4294963200  ;;  %v166_v0 = vld [vmem:[#allocation8 + $0xf8] sm:$0xff]  ;;  %v165_v4 = vld [vmem:[#allocation8 + $0xf0] sm:$0xff]  ;;  %s1556_s30 = smov [#allocation13]  }
  0x51   :  { %v230_v1 = vld [vmem:[#allocation8 + $0x2f8] sm:$0xff]  ;;  %1038 = vmatprep.subr.mxu1 %v166_v0  ;;  %v229_v5 = vld [vmem:[#allocation8 + $0x2f0] sm:$0xff]  ;;  %v164_v8 = vld [vmem:[#allocation8 + $0xe8] sm:$0xff]  ;;  %s989_s11 = sshll.u32 %s1556_s30, 4  ;;  %s990_s11 = int_to_ptr.vmem [resolvable:$true] %s989_s11 }
  0x52   :  { %v150_v2 = vld [vmem:[#allocation8 + $0x78] sm:$0xff]  ;;  %1114 = vmatprep.subr.mxu0 %v230_v1  ;;  %v149_v6 = vld [vmem:[#allocation8 + $0x70] sm:$0xff]  ;;  %v228_v9 = vld [vmem:[#allocation8 + $0x2e8] sm:$0xff]  ;;  %p1474_p3 = scmp.lt.s32.totalorder %s990_s11, %s990_s11 }
  0x53   :  { %v214_v3 = vld [vmem:[#allocation8 + $0x278] sm:$0xff]  ;;  %1039 = vmatpush3.msra.mxu1 %v150_v2  ;;  %v213_v7 = vld [vmem:[#allocation8 + $0x270] sm:$0xff]  ;;  %v148_v10 = vld [vmem:[#allocation8 + $0x68] sm:$0xff] }
  0x54   :  { %1115 = vmatpush3.msra.mxu0 %v214_v3  ;;  %1040 = vmatprep.subr.mxu1 %v165_v4  ;;  %v212_v11 = vld [vmem:[#allocation8 + $0x268] sm:$0xff]  ;;  %v163_v12 = vld [vmem:[#allocation8 + $0xe0] sm:$0xff]  ;;  %v162_v16 = vld [vmem:[#allocation8 + $0xd8] sm:$0xff] }
  0x55   :  { %1116 = vmatprep.subr.mxu0 %v229_v5  ;;  %1041 = vmatpush3.msra.mxu1 %v149_v6  ;;  %v227_v13 = vld [vmem:[#allocation8 + $0x2e0] sm:$0xff]  ;;  %v226_v17 = vld [vmem:[#allocation8 + $0x2d8] sm:$0xff]  ;;  %v161_v20 = vld [vmem:[#allocation8 + $0xd0] sm:$0xff] }
  0x56   :  { %1117 = vmatpush3.msra.mxu0 %v213_v7  ;;  %1042 = vmatprep.subr.mxu1 %v164_v8  ;;  %v147_v14 = vld [vmem:[#allocation8 + $0x60] sm:$0xff]  ;;  %v146_v18 = vld [vmem:[#allocation8 + $0x58] sm:$0xff]  ;;  %v225_v21 = vld [vmem:[#allocation8 + $0x2d0] sm:$0xff] }
  0x57   :  { %1118 = vmatprep.subr.mxu0 %v228_v9  ;;  %v211_v15 = vld [vmem:[#allocation8 + $0x260] sm:$0xff]  ;;  %1043 = vmatpush3.msra.mxu1 %v148_v10  ;;  %v210_v19 = vld [vmem:[#allocation8 + $0x258] sm:$0xff]  ;;  %v145_v22 = vld [vmem:[#allocation8 + $0x50] sm:$0xff] }
  0x58   :  { %1119 = vmatpush3.msra.mxu0 %v212_v11  ;;  %1044 = vmatprep.subr.mxu1 %v163_v12  ;;  %v209_v23 = vld [vmem:[#allocation8 + $0x250] sm:$0xff]  ;;  %v160_v24 = vld [vmem:[#allocation8 + $0xc8] sm:$0xff]  ;;  %v159_v28 = vld [vmem:[#allocation8 + $0xc0] sm:$0xff] }
  0x59   :  { %1120 = vmatprep.subr.mxu0 %v227_v13  ;;  %1045 = vmatpush3.msra.mxu1 %v147_v14  ;;  %v224_v25 = vld [vmem:[#allocation8 + $0x2c8] sm:$0xff]  ;;  %v223_v29 = vld [vmem:[#allocation8 + $0x2c0] sm:$0xff]  ;;  %v158_v32 = vld [vmem:[#allocation8 + $0xb8] sm:$0xff] }
  0x5a   :  { %1121 = vmatpush3.msra.mxu0 %v211_v15  ;;  %1046 = vmatprep.subr.mxu1 %v162_v16  ;;  %v144_v26 = vld [vmem:[#allocation8 + $0x48] sm:$0xff]  ;;  %v143_v30 = vld [vmem:[#allocation8 + $0x40] sm:$0xff]  ;;  %v222_v33 = vld [vmem:[#allocation8 + $0x2b8] sm:$0xff] }
  0x5b   :  { %1122 = vmatprep.subr.mxu0 %v226_v17  ;;  %1047 = vmatpush3.msra.mxu1 %v146_v18  ;;  %v208_v27 = vld [vmem:[#allocation8 + $0x248] sm:$0xff]  ;;  %v207_v31 = vld [vmem:[#allocation8 + $0x240] sm:$0xff]  ;;  %v142_v34 = vld [vmem:[#allocation8 + $0x38] sm:$0xff] }
  0x5c   :  { %1123 = vmatpush3.msra.mxu0 %v210_v19  ;;  %1048 = vmatprep.subr.mxu1 %v161_v20  ;;  %v206_v35 = vld [vmem:[#allocation8 + $0x238] sm:$0xff]  ;;  %v157_v36 = vld [vmem:[#allocation8 + $0xb0] sm:$0xff]  ;;  %v156_v40 = vld [vmem:[#allocation8 + $0xa8] sm:$0xff] }
  0x5d   :  { %1124 = vmatprep.subr.mxu0 %v225_v21  ;;  %1049 = vmatpush3.msra.mxu1 %v145_v22  ;;  %v221_v37 = vld [vmem:[#allocation8 + $0x2b0] sm:$0xff]  ;;  %v220_v41 = vld [vmem:[#allocation8 + $0x2a8] sm:$0xff]  ;;  %v155_v44 = vld [vmem:[#allocation8 + $0xa0] sm:$0xff] }
  0x5e   :  { %1125 = vmatpush3.msra.mxu0 %v209_v23  ;;  %1050 = vmatprep.subr.mxu1 %v160_v24  ;;  %v141_v38 = vld [vmem:[#allocation8 + $0x30] sm:$0xff]  ;;  %v140_v42 = vld [vmem:[#allocation8 + $0x28] sm:$0xff]  ;;  %v219_v45 = vld [vmem:[#allocation8 + $0x2a0] sm:$0xff] }
  0x5f   :  { %1126 = vmatprep.subr.mxu0 %v224_v25  ;;  %1051 = vmatpush3.msra.mxu1 %v144_v26  ;;  %v205_v39 = vld [vmem:[#allocation8 + $0x230] sm:$0xff]  ;;  %v204_v43 = vld [vmem:[#allocation8 + $0x228] sm:$0xff]  ;;  %v139_v46 = vld [vmem:[#allocation8 + $0x20] sm:$0xff] }
  0x60   :  { %1127 = vmatpush3.msra.mxu0 %v208_v27  ;;  %1052 = vmatprep.subr.mxu1 %v159_v28  ;;  %v203_v47 = vld [vmem:[#allocation8 + $0x220] sm:$0xff]  ;;  %v154_v48 = vld [vmem:[#allocation8 + $0x98] sm:$0xff]  ;;  %v153_v52 = vld [vmem:[#allocation8 + $0x90] sm:$0xff] }
  0x61   :  { %1128 = vmatprep.subr.mxu0 %v223_v29  ;;  %1053 = vmatpush3.msra.mxu1 %v143_v30  ;;  %v218_v49 = vld [vmem:[#allocation8 + $0x298] sm:$0xff]  ;;  %v217_v53 = vld [vmem:[#allocation8 + $0x290] sm:$0xff]  ;;  %v152_v56 = vld [vmem:[#allocation8 + $0x88] sm:$0xff] }
  0x62   :  { %1129 = vmatpush3.msra.mxu0 %v207_v31  ;;  %1054 = vmatprep.subr.mxu1 %v158_v32  ;;  %v138_v50 = vld [vmem:[#allocation8 + $0x18] sm:$0xff]  ;;  %v137_v54 = vld [vmem:[#allocation8 + $0x10] sm:$0xff]  ;;  %v216_v57 = vld [vmem:[#allocation8 + $0x288] sm:$0xff] }
  0x63   :  { %1130 = vmatprep.subr.mxu0 %v222_v33  ;;  %1055 = vmatpush3.msra.mxu1 %v142_v34  ;;  %v202_v51 = vld [vmem:[#allocation8 + $0x218] sm:$0xff]  ;;  %v201_v55 = vld [vmem:[#allocation8 + $0x210] sm:$0xff]  ;;  %v136_v58 = vld [vmem:[#allocation8 + $0x8] sm:$0xff] }
  0x64   :  { %1131 = vmatpush3.msra.mxu0 %v206_v35  ;;  %1056 = vmatprep.subr.mxu1 %v157_v36  ;;  %v200_v59 = vld [vmem:[#allocation8 + $0x208] sm:$0xff]  ;;  %v151_v60 = vld [vmem:[#allocation8 + $0x80] sm:$0xff]  ;;  %v124_v63 = vld [vmem:[#allocation2 + $0x8] sm:$0xff] }
  0x65   :  { %1132 = vmatprep.subr.mxu0 %v221_v37  ;;  %1057 = vmatpush3.msra.mxu1 %v141_v38  ;;  %v215_v61 = vld [vmem:[#allocation8 + $0x280] sm:$0xff]  ;;  %v123_v1 = vld [vmem:[#allocation2] sm:$0xff]  ;;  %v198_v2 = vld [vmem:[#allocation8 + $0x1f8] sm:$0xff] }
  0x66   :  { %1133 = vmatpush3.msra.mxu0 %v205_v39  ;;  %1058 = vmatprep.subr.mxu1 %v156_v40  ;;  %v135_v62 = vld [vmem:[#allocation8] sm:$0xff]  ;;  %v128_v3 = vld [vmem:[#allocation2 + $0x28] sm:$0xff]  ;;  %v127_v6 = vld [vmem:[#allocation2 + $0x20] sm:$0xff] }
  0x67   :  { %1134 = vmatprep.subr.mxu0 %v220_v41  ;;  %1059 = vmatpush3.msra.mxu1 %v140_v42  ;;  %v199_v0 = vld [vmem:[#allocation8 + $0x200] sm:$0xff]  ;;  %v571_v4 = vld [vmem:[#allocation10 + $0x1f8] sm:$0xff]  ;;  %v197_v7 = vld [vmem:[#allocation8 + $0x1f0] sm:$0xff] }
  0x68   :  { %1135 = vmatpush3.msra.mxu0 %v204_v43  ;;  %1060 = vmatprep.subr.mxu1 %v155_v44  ;;  %v182_v5 = vld [vmem:[#allocation8 + $0x178] sm:$0xff]  ;;  %v181_v9 = vld [vmem:[#allocation8 + $0x170] sm:$0xff]  ;;  %v196_v11 = vld [vmem:[#allocation8 + $0x1e8] sm:$0xff] }
  0x69   :  { %1136 = vmatprep.subr.mxu0 %v219_v45  ;;  %1061 = vmatpush3.msra.mxu1 %v139_v46  ;;  %v555_v8 = vld [vmem:[#allocation10 + $0x178] sm:$0xff]  ;;  %v570_v10 = vld [vmem:[#allocation10 + $0x1f0] sm:$0xff]  ;;  %v180_v13 = vld [vmem:[#allocation8 + $0x168] sm:$0xff] }
  0x6a   :  { %1137 = vmatpush3.msra.mxu0 %v203_v47  ;;  %1062 = vmatprep.subr.mxu1 %v154_v48  ;;  %v554_v12 = vld [vmem:[#allocation10 + $0x170] sm:$0xff]  ;;  %v569_v14 = vld [vmem:[#allocation10 + $0x1e8] sm:$0xff]  ;;  %v195_v15 = vld [vmem:[#allocation8 + $0x1e0] sm:$0xff] }
  0x6b   :  { %1138 = vmatprep.subr.mxu0 %v218_v49  ;;  %1063 = vmatpush3.msra.mxu1 %v138_v50  ;;  %v553_v16 = vld [vmem:[#allocation10 + $0x168] sm:$0xff]  ;;  %v179_v17 = vld [vmem:[#allocation8 + $0x160] sm:$0xff]  ;;  %v194_v19 = vld [vmem:[#allocation8 + $0x1d8] sm:$0xff] }
  0x6c   :  { %1139 = vmatpush3.msra.mxu0 %v202_v51  ;;  %1064 = vmatprep.subr.mxu1 %v153_v52  ;;  %v568_v18 = vld [vmem:[#allocation10 + $0x1e0] sm:$0xff]  ;;  %v178_v21 = vld [vmem:[#allocation8 + $0x158] sm:$0xff]  ;;  %v193_v23 = vld [vmem:[#allocation8 + $0x1d0] sm:$0xff] }
  0x6d   :  { %1140 = vmatprep.subr.mxu0 %v217_v53  ;;  %1065 = vmatpush3.msra.mxu1 %v137_v54  ;;  %v552_v20 = vld [vmem:[#allocation10 + $0x160] sm:$0xff]  ;;  %v567_v22 = vld [vmem:[#allocation10 + $0x1d8] sm:$0xff]  ;;  %v177_v25 = vld [vmem:[#allocation8 + $0x150] sm:$0xff] }
  0x6e   :  { %1141 = vmatpush3.msra.mxu0 %v201_v55  ;;  %1066 = vmatprep.subr.mxu1 %v152_v56  ;;  %v551_v24 = vld [vmem:[#allocation10 + $0x158] sm:$0xff]  ;;  %v566_v26 = vld [vmem:[#allocation10 + $0x1d0] sm:$0xff]  ;;  %v192_v27 = vld [vmem:[#allocation8 + $0x1c8] sm:$0xff] }
  0x6f   :  { %1142 = vmatprep.subr.mxu0 %v216_v57  ;;  %1067 = vmatpush3.msra.mxu1 %v136_v58  ;;  %v550_v28 = vld [vmem:[#allocation10 + $0x150] sm:$0xff]  ;;  %v176_v29 = vld [vmem:[#allocation8 + $0x148] sm:$0xff]  ;;  %v191_v31 = vld [vmem:[#allocation8 + $0x1c0] sm:$0xff] }
  0x70   :  { %1143 = vmatpush3.msra.mxu0 %v200_v59  ;;  %1068 = vmatprep.subr.mxu1 %v151_v60  ;;  %v565_v30 = vld [vmem:[#allocation10 + $0x1c8] sm:$0xff]  ;;  %v175_v33 = vld [vmem:[#allocation8 + $0x140] sm:$0xff]  ;;  %v190_v35 = vld [vmem:[#allocation8 + $0x1b8] sm:$0xff] }
  0x71   :  { %1144 = vmatprep.subr.mxu0 %v215_v61  ;;  %1069 = vmatpush3.msra.mxu1 %v135_v62  ;;  %v549_v32 = vld [vmem:[#allocation10 + $0x148] sm:$0xff]  ;;  %v564_v34 = vld [vmem:[#allocation10 + $0x1c0] sm:$0xff]  ;;  %v174_v37 = vld [vmem:[#allocation8 + $0x138] sm:$0xff] }
  0x72   :  { %295 = vmatprep.mubr.f32.mxu1 %v124_v63  ;;  %1145 = vmatpush3.msra.mxu0 %v199_v0  ;;  %v548_v36 = vld [vmem:[#allocation10 + $0x140] sm:$0xff]  ;;  %v563_v38 = vld [vmem:[#allocation10 + $0x1b8] sm:$0xff]  ;;  %v189_v39 = vld [vmem:[#allocation8 + $0x1b0] sm:$0xff] }
  0x73   :  { %296 = vmatmul.mubr.f32.vlgmr.msra.gmra.mxu1 %v123_v1  ;;  %1076 = vmatprep.subr.mxu1 %v198_v2  ;;  %v547_v40 = vld [vmem:[#allocation10 + $0x138] sm:$0xff]  ;;  %v173_v41 = vld [vmem:[#allocation8 + $0x130] sm:$0xff]  ;;  %v188_v43 = vld [vmem:[#allocation8 + $0x1a8] sm:$0xff] }
  0x74   :  { %445 = vmatprep.mubr.f32.mxu0 %v128_v3  ;;  %1190 = vmatprep.subr.mxu0 %v571_v4  ;;  %v562_v42 = vld [vmem:[#allocation10 + $0x1b0] sm:$0xff]  ;;  %v172_v45 = vld [vmem:[#allocation8 + $0x128] sm:$0xff]  ;;  %v187_v47 = vld [vmem:[#allocation8 + $0x1a0] sm:$0xff] }
  0x75   :  { %1077 = vmatpush3.msra.mxu1 %v182_v5  ;;  %446 = vmatmul.mubr.f32.vlgmr.msra.gmra.mxu0 %v127_v6  ;;  %v546_v44 = vld [vmem:[#allocation10 + $0x130] sm:$0xff]  ;;  %v561_v46 = vld [vmem:[#allocation10 + $0x1a8] sm:$0xff]  ;;  %v171_v49 = vld [vmem:[#allocation8 + $0x120] sm:$0xff] }
  0x76   :  { %1078 = vmatprep.subr.mxu1 %v197_v7  ;;  %1191 = vmatpush3.msra.mxu0 %v555_v8  ;;  %v545_v48 = vld [vmem:[#allocation10 + $0x128] sm:$0xff]  ;;  %v560_v50 = vld [vmem:[#allocation10 + $0x1a0] sm:$0xff]  ;;  %v186_v51 = vld [vmem:[#allocation8 + $0x198] sm:$0xff] }
  0x77   :  { %1079 = vmatpush3.msra.mxu1 %v181_v9  ;;  %1192 = vmatprep.subr.mxu0 %v570_v10  ;;  %v544_v52 = vld [vmem:[#allocation10 + $0x120] sm:$0xff]  ;;  %v170_v53 = vld [vmem:[#allocation8 + $0x118] sm:$0xff]  ;;  %v130_v55 = vld [vmem:[#allocation2 + $0x38] sm:$0xff] }
  0x78   :  { %1080 = vmatprep.subr.mxu1 %v196_v11  ;;  %1193 = vmatpush3.msra.mxu0 %v554_v12  ;;  %v559_v54 = vld [vmem:[#allocation10 + $0x198] sm:$0xff]  ;;  %v185_v57 = vld [vmem:[#allocation8 + $0x190] sm:$0xff]  ;;  %v129_v59 = vld [vmem:[#allocation2 + $0x30] sm:$0xff] }
  0x79   :  { %1081 = vmatpush3.msra.mxu1 %v180_v13  ;;  %1194 = vmatprep.subr.mxu0 %v569_v14  ;;  %v543_v56 = vld [vmem:[#allocation10 + $0x118] sm:$0xff]  ;;  %v558_v58 = vld [vmem:[#allocation10 + $0x190] sm:$0xff]  ;;  %v184_v62 = vld [vmem:[#allocation8 + $0x188] sm:$0xff] }
  0x7a   :  { %1082 = vmatprep.subr.mxu1 %v195_v15  ;;  %1195 = vmatpush3.msra.mxu0 %v553_v16  ;;  %v169_v60 = vld [vmem:[#allocation8 + $0x110] sm:$0xff]  ;;  %v134_v63 = vld [vmem:[#allocation2 + $0x58] sm:$0xff]  ;;  %v133_v2 = vld [vmem:[#allocation2 + $0x50] sm:$0xff] }
  0x7b   :  { %1083 = vmatpush3.msra.mxu1 %v179_v17  ;;  %1196 = vmatprep.subr.mxu0 %v568_v18  ;;  %v542_v61 = vld [vmem:[#allocation10 + $0x110] sm:$0xff]  ;;  %v557_v0 = vld [vmem:[#allocation10 + $0x188] sm:$0xff]  ;;  %v183_v3 = vld [vmem:[#allocation8 + $0x180] sm:$0xff] }
  0x7c   :  { %1084 = vmatprep.subr.mxu1 %v194_v19  ;;  %1197 = vmatpush3.msra.mxu0 %v552_v20  ;;  %v168_v1 = vld [vmem:[#allocation8 + $0x108] sm:$0xff]  ;;  %v167_v5 = vld [vmem:[#allocation8 + $0x100] sm:$0xff]  ;;  %v539_v10 = vld [vmem:[#allocation10 + $0xf8] sm:$0xff] }
  0x7d   :  { %1085 = vmatpush3.msra.mxu1 %v178_v21  ;;  %1198 = vmatprep.subr.mxu0 %v567_v22  ;;  %v541_v4 = vld [vmem:[#allocation10 + $0x108] sm:$0xff]  ;;  %v556_v6 = vld [vmem:[#allocation10 + $0x180] sm:$0xff]  ;;  %v878_v12 = vld [vmem:[#allocation11 + $0xf8] sm:$0xff] }
  0x7e   :  { %1086 = vmatprep.subr.mxu1 %v193_v23  ;;  %1199 = vmatpush3.msra.mxu0 %v551_v24  ;;  %v126_v7 = vld [vmem:[#allocation2 + $0x18] sm:$0xff]  ;;  %v540_v8 = vld [vmem:[#allocation10 + $0x100] sm:$0xff]  ;;  %v523_v13 = vld [vmem:[#allocation10 + $0x78] sm:$0xff] }
  0x7f   :  { %1087 = vmatpush3.msra.mxu1 %v177_v25  ;;  %1200 = vmatprep.subr.mxu0 %v566_v26  ;;  %v125_v9 = vld [vmem:[#allocation2 + $0x10] sm:$0xff]  ;;  %v501_v11 = vld [vmem:[#allocation5 + $0x18] sm:$0xff]  ;;  %v538_v15 = vld [vmem:[#allocation10 + $0xf0] sm:$0xff] }
  0x80   :  { %1088 = vmatprep.subr.mxu1 %v192_v27  ;;  %1201 = vmatpush3.msra.mxu0 %v550_v28  ;;  %v500_v14 = vld [vmem:[#allocation5 + $0x10] sm:$0xff]  ;;  %v862_v16 = vld [vmem:[#allocation11 + $0x78] sm:$0xff]  ;;  %v877_v18 = vld [vmem:[#allocation11 + $0xf0] sm:$0xff] }
  0x81   :  { %1089 = vmatpush3.msra.mxu1 %v176_v29  ;;  %1202 = vmatprep.subr.mxu0 %v565_v30  ;;  %v132_v17 = vld [vmem:[#allocation2 + $0x48] sm:$0xff]  ;;  %v522_v19 = vld [vmem:[#allocation10 + $0x70] sm:$0xff]  ;;  %v537_v22 = vld [vmem:[#allocation10 + $0xe8] sm:$0xff] }
  0x82   :  { %1090 = vmatprep.subr.mxu1 %v191_v31  ;;  %1203 = vmatpush3.msra.mxu0 %v549_v32  ;;  %v861_v20 = vld [vmem:[#allocation11 + $0x70] sm:$0xff]  ;;  %v876_v23 = vld [vmem:[#allocation11 + $0xe8] sm:$0xff]  ;;  %v536_v26 = vld [vmem:[#allocation10 + $0xe0] sm:$0xff] }
  0x83   :  { %1091 = vmatpush3.msra.mxu1 %v175_v33  ;;  %1204 = vmatprep.subr.mxu0 %v564_v34  ;;  %v131_v21 = vld [vmem:[#allocation2 + $0x40] sm:$0xff]  ;;  %v521_v24 = vld [vmem:[#allocation10 + $0x68] sm:$0xff]  ;;  %v875_v27 = vld [vmem:[#allocation11 + $0xe0] sm:$0xff] }
  0x84   :  { %1092 = vmatprep.subr.mxu1 %v190_v35  ;;  %1205 = vmatpush3.msra.mxu0 %v548_v36  ;;  %v860_v25 = vld [vmem:[#allocation11 + $0x68] sm:$0xff]  ;;  %v520_v28 = vld [vmem:[#allocation10 + $0x60] sm:$0xff]  ;;  %v535_v30 = vld [vmem:[#allocation10 + $0xd8] sm:$0xff] }
  0x85   :  { %1093 = vmatpush3.msra.mxu1 %v174_v37  ;;  %1206 = vmatprep.subr.mxu0 %v563_v38  ;;  %v859_v29 = vld [vmem:[#allocation11 + $0x60] sm:$0xff]  ;;  %v874_v31 = vld [vmem:[#allocation11 + $0xd8] sm:$0xff]  ;;  %v534_v34 = vld [vmem:[#allocation10 + $0xd0] sm:$0xff] }
  0x86   :  { %1094 = vmatprep.subr.mxu1 %v189_v39  ;;  %1207 = vmatpush3.msra.mxu0 %v547_v40  ;;  %v519_v32 = vld [vmem:[#allocation10 + $0x58] sm:$0xff]  ;;  %v873_v35 = vld [vmem:[#allocation11 + $0xd0] sm:$0xff]  ;;  %v533_v38 = vld [vmem:[#allocation10 + $0xc8] sm:$0xff] }
  0x87   :  { %1095 = vmatpush3.msra.mxu1 %v173_v41  ;;  %1208 = vmatprep.subr.mxu0 %v562_v42  ;;  %v858_v33 = vld [vmem:[#allocation11 + $0x58] sm:$0xff]  ;;  %v518_v36 = vld [vmem:[#allocation10 + $0x50] sm:$0xff]  ;;  %v872_v39 = vld [vmem:[#allocation11 + $0xc8] sm:$0xff] }
  0x88   :  { %1096 = vmatprep.subr.mxu1 %v188_v43  ;;  %1209 = vmatpush3.msra.mxu0 %v546_v44  ;;  %v857_v37 = vld [vmem:[#allocation11 + $0x50] sm:$0xff]  ;;  %v517_v40 = vld [vmem:[#allocation10 + $0x48] sm:$0xff]  ;;  %v532_v42 = vld [vmem:[#allocation10 + $0xc0] sm:$0xff] }
  0x89   :  { %1097 = vmatpush3.msra.mxu1 %v172_v45  ;;  %1210 = vmatprep.subr.mxu0 %v561_v46  ;;  %v856_v41 = vld [vmem:[#allocation11 + $0x48] sm:$0xff]  ;;  %v871_v43 = vld [vmem:[#allocation11 + $0xc0] sm:$0xff]  ;;  %v531_v46 = vld [vmem:[#allocation10 + $0xb8] sm:$0xff] }
  0x8a   :  { %1098 = vmatprep.subr.mxu1 %v187_v47  ;;  %1211 = vmatpush3.msra.mxu0 %v545_v48  ;;  %v516_v44 = vld [vmem:[#allocation10 + $0x40] sm:$0xff]  ;;  %v870_v47 = vld [vmem:[#allocation11 + $0xb8] sm:$0xff] }
  0x8b   :  { %1099 = vmatpush3.msra.mxu1 %v171_v49  ;;  %1212 = vmatprep.subr.mxu0 %v560_v50  ;;  %v855_v45 = vld [vmem:[#allocation11 + $0x40] sm:$0xff]  ;;  %v515_v48 = vld [vmem:[#allocation10 + $0x38] sm:$0xff]  ;;  %v530_v50 = vld [vmem:[#allocation10 + $0xb0] sm:$0xff] }
  0x8c   :  { %1100 = vmatprep.subr.mxu1 %v186_v51  ;;  %1213 = vmatpush3.msra.mxu0 %v544_v52  ;;  %v854_v49 = vld [vmem:[#allocation11 + $0x38] sm:$0xff]  ;;  %v869_v51 = vld [vmem:[#allocation11 + $0xb0] sm:$0xff] }
  0x8d   :  { %1101 = vmatpush3.msra.mxu1 %v170_v53  ;;  %1214 = vmatprep.subr.mxu0 %v559_v54  ;;  %v514_v52 = vld [vmem:[#allocation10 + $0x30] sm:$0xff]  ;;  %v529_v54 = vld [vmem:[#allocation10 + $0xa8] sm:$0xff] }
  0x8e   :  { %300 = vmatprep.mubr.f32.mxu1 %v130_v55  ;;  %1215 = vmatpush3.msra.mxu0 %v543_v56  ;;  %v853_v53 = vld [vmem:[#allocation11 + $0x30] sm:$0xff]  ;;  %v868_v55 = vld [vmem:[#allocation11 + $0xa8] sm:$0xff] }
  0x8f   :  { %1102 = vmatprep.subr.mxu1 %v185_v57  ;;  %1216 = vmatprep.subr.mxu0 %v558_v58  ;;  %v513_v56 = vld [vmem:[#allocation10 + $0x28] sm:$0xff]  ;;  %v528_v58 = vld [vmem:[#allocation10 + $0xa0] sm:$0xff] }
  0x90   :  { %301 = vmatmul.mubr.f32.gmra.mxu1 %v129_v59  ;;  %1217 = vmatpush3.msra.mxu0 %v542_v61  ;;  %v852_v57 = vld [vmem:[#allocation11 + $0x28] sm:$0xff]  ;;  %v867_v59 = vld [vmem:[#allocation11 + $0xa0] sm:$0xff] }
  0x91   :  { %1103 = vmatpush3.msra.mxu1 %v169_v60  ;;  %450 = vmatprep.mubr.f32.mxu0 %v134_v63  ;;  %v512_v60 = vld [vmem:[#allocation10 + $0x20] sm:$0xff]  ;;  %v866_v63 = vld [vmem:[#allocation11 + $0x98] sm:$0xff] }
  0x92   :  { %1104 = vmatprep.subr.mxu1 %v184_v62  ;;  %1218 = vmatprep.subr.mxu0 %v557_v0  ;;  %v851_v61 = vld [vmem:[#allocation11 + $0x20] sm:$0xff]  ;;  %v527_v62 = vld [vmem:[#allocation10 + $0x98] sm:$0xff] }
  0x93   :  { %1105 = vmatpush3.msra.mxu1 %v168_v1  ;;  %451 = vmatmul.mubr.f32.gmra.mxu0 %v133_v2  ;;  %v511_v0 = vld [vmem:[#allocation10 + $0x18] sm:$0xff]  ;;  %v526_v2 = vld [vmem:[#allocation10 + $0x90] sm:$0xff] }
  0x94   :  { %1106 = vmatprep.subr.mxu1 %v183_v3  ;;  %1219 = vmatpush3.msra.mxu0 %v541_v4  ;;  %v850_v1 = vld [vmem:[#allocation11 + $0x18] sm:$0xff]  ;;  %v865_v3 = vld [vmem:[#allocation11 + $0x90] sm:$0xff] }
  0x95   :  { %1107 = vmatpush3.msra.mxu1 %v167_v5  ;;  %1220 = vmatprep.subr.mxu0 %v556_v6  ;;  %v510_v4 = vld [vmem:[#allocation10 + $0x10] sm:$0xff] }
  0x96   :  { %370 = vmatprep.mubr.f32.mxu1 %v126_v7  ;;  %1221 = vmatpush3.msra.mxu0 %v540_v8  ;;  %v506_v5 = vld [vmem:[#allocation5 + $0x40] sm:$0xff]  ;;  %v525_v7 = vld [vmem:[#allocation10 + $0x88] sm:$0xff] }
  0x97   :  { %371 = vmatmul.mubr.f32.vlgmr.msra.gmra.mxu1 %v125_v9  ;;  %1152 = vmatprep.subr.mxu1 %v539_v10  ;;  %v849_v6 = vld [vmem:[#allocation11 + $0x10] sm:$0xff]  ;;  %v505_v8 = vld [vmem:[#allocation5 + $0x38] sm:$0xff] }
  0x98   :  { %727 = vmatprep.mubr.f32.mxu0 %v501_v11  ;;  %1246 = vmatprep.subr.mxu0 %v878_v12  ;;  %v864_v9 = vld [vmem:[#allocation11 + $0x88] sm:$0xff]  ;;  %v524_v12 = vld [vmem:[#allocation10 + $0x80] sm:$0xff] }
  0x99   :  { %1153 = vmatpush3.msra.mxu1 %v523_v13  ;;  %728 = vmatmul.mubr.f32.vlgmr.msra.gmra.mxu0 %v500_v14  ;;  %v509_v10 = vld [vmem:[#allocation10 + $0x8] sm:$0xff]  ;;  %v863_v13 = vld [vmem:[#allocation11 + $0x80] sm:$0xff] }
  0x9a   :  { %1154 = vmatprep.subr.mxu1 %v538_v15  ;;  %1247 = vmatpush3.msra.mxu0 %v862_v16  ;;  %v848_v11 = vld [vmem:[#allocation11 + $0x8] sm:$0xff]  ;;  %v508_v14 = vld [vmem:[#allocation10] sm:$0xff]  ;;  %v499_v15 = vld [vmem:[#allocation5 + $0x8] sm:$0xff] }
  0x9b   :  { %375 = vmatprep.mubr.f32.mxu1 %v132_v17  ;;  %1248 = vmatprep.subr.mxu0 %v877_v18  ;;  %v847_v16 = vld [vmem:[#allocation11] sm:$0xff]  ;;  %v844_v17 = vld [vmem:[#allocation7 + $0x8] sm:$0xff]  ;;  %v498_v18 = vld [vmem:[#allocation5] sm:$0xff] }
  0x9c   :  { %1155 = vmatpush3.msra.mxu1 %v522_v19  ;;  %1249 = vmatpush3.msra.mxu0 %v861_v20  ;;  %v587_v19 = vld [vmem:[#allocation10 + $0x278] sm:$0xff]  ;;  %v843_v20 = vld [vmem:[#allocation7] sm:$0xff] }
  0x9d   :  { %376 = vmatmul.mubr.f32.gmra.mxu1 %v131_v21  ;;  %1156 = vmatprep.subr.mxu1 %v537_v22  ;;  %v586_v21 = vld [vmem:[#allocation10 + $0x270] sm:$0xff]  ;;  %v846_v22 = vld [vmem:[#allocation7 + $0x18] sm:$0xff] }
  0x9e   :  { %1250 = vmatprep.subr.mxu0 %v876_v23  ;;  %1157 = vmatpush3.msra.mxu1 %v521_v24  ;;  %v504_v23 = vld [vmem:[#allocation5 + $0x30] sm:$0xff]  ;;  %v585_v24 = vld [vmem:[#allocation10 + $0x268] sm:$0xff] }
  0x9f   :  { %1251 = vmatpush3.msra.mxu0 %v860_v25  ;;  %1158 = vmatprep.subr.mxu1 %v536_v26  ;;  %v503_v25 = vld [vmem:[#allocation5 + $0x28] sm:$0xff]  ;;  %v845_v26 = vld [vmem:[#allocation7 + $0x10] sm:$0xff] }
  0xa0   :  { %1252 = vmatprep.subr.mxu0 %v875_v27  ;;  %1159 = vmatpush3.msra.mxu1 %v520_v28  ;;  %v584_v27 = vld [vmem:[#allocation10 + $0x260] sm:$0xff]  ;;  %v502_v28 = vld [vmem:[#allocation5 + $0x20] sm:$0xff] }
  0xa1   :  { %1253 = vmatpush3.msra.mxu0 %v859_v29  ;;  %1160 = vmatprep.subr.mxu1 %v535_v30  ;;  %v583_v29 = vld [vmem:[#allocation10 + $0x258] sm:$0xff]  ;;  %v582_v30 = vld [vmem:[#allocation10 + $0x250] sm:$0xff] }
  0xa2   :  { %1254 = vmatprep.subr.mxu0 %v874_v31  ;;  %1161 = vmatpush3.msra.mxu1 %v519_v32  ;;  %v581_v31 = vld [vmem:[#allocation10 + $0x248] sm:$0xff]  ;;  %v580_v32 = vld [vmem:[#allocation10 + $0x240] sm:$0xff] }
  0xa3   :  { %1255 = vmatpush3.msra.mxu0 %v858_v33  ;;  %1162 = vmatprep.subr.mxu1 %v534_v34  ;;  %v579_v33 = vld [vmem:[#allocation10 + $0x238] sm:$0xff]  ;;  %v578_v34 = vld [vmem:[#allocation10 + $0x230] sm:$0xff] }
  0xa4   :  { %1256 = vmatprep.subr.mxu0 %v873_v35  ;;  %1163 = vmatpush3.msra.mxu1 %v518_v36  ;;  %v577_v35 = vld [vmem:[#allocation10 + $0x228] sm:$0xff]  ;;  %v576_v36 = vld [vmem:[#allocation10 + $0x220] sm:$0xff] }
  0xa5   :  { %1257 = vmatpush3.msra.mxu0 %v857_v37  ;;  %1164 = vmatprep.subr.mxu1 %v533_v38  ;;  %v575_v37 = vld [vmem:[#allocation10 + $0x218] sm:$0xff]  ;;  %v574_v38 = vld [vmem:[#allocation10 + $0x210] sm:$0xff] }
  0xa6   :  { %1258 = vmatprep.subr.mxu0 %v872_v39  ;;  %1165 = vmatpush3.msra.mxu1 %v517_v40  ;;  %v573_v39 = vld [vmem:[#allocation10 + $0x208] sm:$0xff]  ;;  %v572_v40 = vld [vmem:[#allocation10 + $0x200] sm:$0xff] }
  0xa7   :  { %1259 = vmatpush3.msra.mxu0 %v856_v41  ;;  %1166 = vmatprep.subr.mxu1 %v532_v42  ;;  %v507_v41 = vld [vmem:[#allocation5 + $0x48] sm:$0xff] }
  0xa8   :  { %1260 = vmatprep.subr.mxu0 %v871_v43  ;;  %1167 = vmatpush3.msra.mxu1 %v516_v44 }
  0xa9   :  { %1261 = vmatpush3.msra.mxu0 %v855_v45  ;;  %1168 = vmatprep.subr.mxu1 %v531_v46 }
  0xaa   :  { %1262 = vmatprep.subr.mxu0 %v870_v47  ;;  %1169 = vmatpush3.msra.mxu1 %v515_v48 }
  0xab   :  { %1263 = vmatpush3.msra.mxu0 %v854_v49  ;;  %1170 = vmatprep.subr.mxu1 %v530_v50 }
  0xac   :  { %1264 = vmatprep.subr.mxu0 %v869_v51  ;;  %1171 = vmatpush3.msra.mxu1 %v514_v52 }
  0xad   :  { %1265 = vmatpush3.msra.mxu0 %v853_v53  ;;  %1172 = vmatprep.subr.mxu1 %v529_v54 }
  0xae   :  { %1266 = vmatprep.subr.mxu0 %v868_v55  ;;  %1173 = vmatpush3.msra.mxu1 %v513_v56 }
  0xaf   :  { %1267 = vmatpush3.msra.mxu0 %v852_v57  ;;  %1174 = vmatprep.subr.mxu1 %v528_v58 }
  0xb0   :  { %1268 = vmatprep.subr.mxu0 %v867_v59  ;;  %1175 = vmatpush3.msra.mxu1 %v512_v60 }
  0xb1   :  { %1269 = vmatpush3.msra.mxu0 %v851_v61  ;;  %1176 = vmatprep.subr.mxu1 %v527_v62 }
  0xb2   :  { %1270 = vmatprep.subr.mxu0 %v866_v63  ;;  %1177 = vmatpush3.msra.mxu1 %v511_v0 }
  0xb3   :  { %1271 = vmatpush3.msra.mxu0 %v850_v1  ;;  %1178 = vmatprep.subr.mxu1 %v526_v2 }
  0xb4   :  { %1272 = vmatprep.subr.mxu0 %v865_v3  ;;  %1179 = vmatpush3.msra.mxu1 %v510_v4 }
  0xb5   :  { %732 = vmatprep.mubr.f32.mxu0 %v506_v5  ;;  %1273 = vmatpush3.msra.mxu0 %v849_v6 }
  0xb6   :  { %1180 = vmatprep.subr.mxu1 %v525_v7  ;;  %733 = vmatmul.mubr.f32.gmra.mxu0 %v505_v8 }
  0xb7   :  { %1274 = vmatprep.subr.mxu0 %v864_v9  ;;  %1181 = vmatpush3.msra.mxu1 %v509_v10 }
  0xb8   :  { %1275 = vmatpush3.msra.mxu0 %v848_v11  ;;  %1182 = vmatprep.subr.mxu1 %v524_v12 }
  0xb9   :  { %1276 = vmatprep.subr.mxu0 %v863_v13  ;;  %1183 = vmatpush3.msra.mxu1 %v508_v14 }
  0xba   :  { %652 = vmatprep.mubr.f32.mxu1 %v499_v15  ;;  %1277 = vmatpush3.msra.mxu0 %v847_v16 }
  0xbb   :  { %943 = vmatprep.mubr.f32.mxu0 %v844_v17  ;;  %653 = vmatmul.mubr.f32.vlgmr.msra.gmra.mxu1 %v498_v18 }
  0xbc   :  { %1284 = vmatprep.subr.mxu1 %v587_v19  ;;  %944 = vmatmul.mubr.f32.vlgmr.msra.gmra.mxu0 %v843_v20 }
  0xbd   :  { %1285 = vmatpush3.msra.mxu1 %v587_v19  ;;  %948 = vmatprep.mubr.f32.mxu0 %v846_v22 }
  0xbe   :  { %1286 = vmatprep.subr.mxu1 %v586_v21  ;;  %657 = vmatprep.mubr.f32.mxu1 %v504_v23 }
  0xbf   :  { %1287 = vmatpush3.msra.mxu1 %v586_v21 }
  0xc0   :  { %1288 = vmatprep.subr.mxu1 %v585_v24  ;;  %658 = vmatmul.mubr.f32.gmra.mxu1 %v503_v25 }
  0xc1   :  { %949 = vmatmul.mubr.f32.gmra.mxu0 %v845_v26  ;;  %1289 = vmatpush3.msra.mxu1 %v585_v24  ;;  %v116_v24 = vlaneseq }
  0xc2   :  { %1290 = vmatprep.subr.mxu1 %v584_v27  ;;  %1316 = vmatprep.mubr.f32.mxu1 %v502_v28  ;;  %v1555_v28 = vmov 0.0  }
  0xc3   :  { %1291 = vmatpush3.msra.mxu1 %v584_v27  ;;  %v117_v25 = vand.u32 127, %v116_v24 }
  0xc4   :  { %1292 = vmatprep.subr.mxu1 %v583_v29 }
  0xc5   :  { %1293 = vmatpush3.msra.mxu1 %v583_v29  ;;  %vm118_vm0 = vcmp.lt.s32.totalorder %v117_v25, 32 }
  0xc6   :  { %1294 = vmatprep.subr.mxu1 %v582_v30  ;;  %v1035_v29 = vsel %vm118_vm0, 1.0, %v1555_v28 }
  0xc7   :  { %1295 = vmatpush3.msra.mxu1 %v582_v30 }
  0xc8   :  { %1296 = vmatprep.subr.mxu1 %v581_v31 }
  0xc9   :  { %1297 = vmatpush3.msra.mxu1 %v581_v31 }
  0xca   :  { %1298 = vmatprep.subr.mxu1 %v580_v32 }
  0xcb   :  { %1299 = vmatpush3.msra.mxu1 %v580_v32 }
  0xcc   :  { %1300 = vmatprep.subr.mxu1 %v579_v33 }
  0xcd   :  { %1301 = vmatpush3.msra.mxu1 %v579_v33 }
  0xce   :  { %1302 = vmatprep.subr.mxu1 %v578_v34 }
  0xcf   :  { %1303 = vmatpush3.msra.mxu1 %v578_v34 }
  0xd0   :  { %1304 = vmatprep.subr.mxu1 %v577_v35 }
  0xd1   :  { %1305 = vmatpush3.msra.mxu1 %v577_v35 }
  0xd2   :  { %1306 = vmatprep.subr.mxu1 %v576_v36 }
  0xd3   :  { %1307 = vmatpush3.msra.mxu1 %v576_v36 }
  0xd4   :  { %1308 = vmatprep.subr.mxu1 %v575_v37 }
  0xd5   :  { %1309 = vmatpush3.msra.mxu1 %v575_v37 }
  0xd6   :  { %1310 = vmatprep.subr.mxu1 %v574_v38 }
  0xd7   :  { %1311 = vmatpush3.msra.mxu1 %v574_v38 }
  0xd8   :  { %1312 = vmatprep.subr.mxu1 %v573_v39 }
  0xd9   :  { %1313 = vmatpush3.msra.mxu1 %v573_v39 }
  0xda   :  { %1314 = vmatprep.subr.mxu1 %v572_v40 }
  0xdb   :  { %1315 = vmatpush3.msra.mxu1 %v572_v40 }
  0xdc   :  { %1317 = vmatmul.mubr.f32.vlgmr.msra.gmra.mxu1 %v507_v41 }
 0x133   :  { %v1070_v42 = vpop.f32.mrf.mxu1 }
 0x135   :  { %v1071_v43 = vpop.f32.mrf.mxu1  ;;  %v1146_v45 = vpop.f32.mrf.mxu0 }
 0x136   :  { %v1072_v51 = vadd.f32 %v1071_v43, %v1070_v42 }
 0x137   :  { %v1147_v47 = vpop.f32.mrf.mxu0 }
 0x138   :  { %v1148_v53 = vadd.f32 %v1147_v47, %v1146_v45 }
 0x150   :  { %v1073_v44 = vpop.f32.mrf.mxu1 }
 0x152   :  { %v1074_v46 = vpop.f32.mrf.mxu1 }
 0x153   :  { %v1149_v50 = vpop.f32.mrf.mxu0  ;;  %v1075_v59 = vadd.f32 %v1074_v46, %v1073_v44 }
 0x155   :  { %v1150_v56 = vpop.f32.mrf.mxu0 }
 0x156   :  { %v1151_v61 = vadd.f32 %v1150_v56, %v1149_v50 }
 0x157   :  { %v1108_v48 = vpop.f32.mrf.mxu1 }
 0x159   :  { %v1109_v49 = vpop.f32.mrf.mxu1  ;;  %v1222_v0 = vpop.f32.mrf.mxu0 }
 0x15a   :  { %v1110_v52 = vadd.f32 %v1109_v49, %v1108_v48 }
 0x15b   :  { %v1223_v1 = vpop.f32.mrf.mxu0 }
 0x15c   :  { %v373_v54 = vadd.f32 %v1110_v52, %v1072_v51  ;;  %v1224_v15 = vadd.f32 %v1223_v1, %v1222_v0  ;;  %v1036_v1 = vld [vmem:[%s1694_s6] ss:$0 sm:$0xff]  ;;  %s1469_s6 = scalar_lea.vmem %s990_s11, 256 }
 0x15d   :  { %v1111_v55 = vpop.f32.mrf.mxu1  ;;  %p1470_p2 = scmp.ne.s32.totalorder %s990_s11, %s1469_s6  ;;  %p1475_p4 = scmp.lt.s32.totalorder %s1469_s6, %s1469_s6 }
 0x15e   :  { %v448_v57 = vadd.f32 %v1148_v53, %v373_v54 }
 0x15f   :  { %v1112_v58 = vpop.f32.mrf.mxu1  ;;  %p1476_p5 = por %p1475_p4, %p1474_p3 }
 0x160   :  { %v1113_v60 = vadd.f32 %v1112_v58, %v1111_v55  ;;  %456 = vadd.xlane.f32.xlu1 %v448_v57 }
 0x161   :  { %p1477_p6 = pnand %p1476_p5, %p1470_p2 }
 0x162   :  { %v378_v62 = vadd.f32 %v1113_v60, %v1075_v59 }
 0x164   :  { %v453_v63 = vadd.f32 %v1151_v61, %v378_v62 }
 0x166   :  { %458 = vadd.xlane.f32.xlu1 %v453_v63 }
 0x176   :  { %v1225_v2 = vpop.f32.mrf.mxu0 }
 0x178   :  { %v1226_v3 = vpop.f32.mrf.mxu0 }
 0x179   :  { %v1227_v13 = vadd.f32 %v1226_v3, %v1225_v2  ;;  %v1659_v3 = vld [vmem:[%s1695_s7] ss:$0 sm:$0xff] }
 0x17b   :  { %v1184_v9 = vpop.f32.mrf.mxu1 }
 0x17c   :  { %v1278_v4 = vpop.f32.mrf.mxu0 }
 0x17d   :  { %v1185_v10 = vpop.f32.mrf.mxu1 }
 0x17e   :  { %v1279_v5 = vpop.f32.mrf.mxu0  ;;  %v1186_v16 = vadd.f32 %v1185_v10, %v1184_v9 }
 0x17f   :  { %v1280_v23 = vadd.f32 %v1279_v5, %v1278_v4 }
 0x180   :  { %v1187_v11 = vpop.f32.mrf.mxu1  ;;  %v730_v21 = vadd.f32 %v1224_v15, %v1186_v16 }
 0x181   :  { %v1281_v6 = vpop.f32.mrf.mxu0 }
 0x182   :  { %v1188_v12 = vpop.f32.mrf.mxu1 }
 0x183   :  { %v1282_v7 = vpop.f32.mrf.mxu0  ;;  %v1189_v14 = vadd.f32 %v1188_v12, %v1187_v11 }
 0x184   :  { %v1283_v8 = vadd.f32 %v1282_v7, %v1281_v6 }
 0x185   :  { %v735_v17 = vadd.f32 %v1227_v13, %v1189_v14 }
 0x186   :  { %956 = vadd.xlane.f32.xlu1 %v1283_v8 }
 0x19c   :  { %v1318_v18 = vpop.f32.mrf.mxu1 }
 0x19d   :  { %v810_v19 = vadd.f32 %v1318_v18, %v735_v17 }
 0x19e   :  { %v804_v20 = vpop.f32.mrf.mxu1 }
 0x19f   :  { %815 = vadd.xlane.f32.xlu0 %v810_v19  ;;  %v805_v22 = vadd.f32 %v804_v20, %v730_v21 }
 0x1a3   :  { %813 = vadd.xlane.f32.xlu0 %v805_v22 }
 0x1a7   :  { %954 = vadd.xlane.f32.xlu0 %v1280_v23 }
 0x1e9   :  { %v457_v26 = vpop.xlane.xlu1 %456 }
 0x1ea   :  { %v460_v27 = vmul.f32 0.03125, %v457_v26 }
 0x1ec   :  { %v462_v30 = vsub.f32 %v448_v57, %v460_v27 }
 0x1ee   :  { %v464_v31 = vmul.f32 %v1035_v29, %v462_v30 }
 0x1ef   :  { %v459_v32 = vpop.xlane.xlu1 %458 }
 0x1f0   :  { %v461_v33 = vmul.f32 0.03125, %v459_v32  ;;  %v466_v34 = vmul.f32 %v464_v31, %v464_v31 }
 0x1f2   :  { %v463_v35 = vsub.f32 %v453_v63, %v461_v33  ;;  %468 = vadd.xlane.f32.xlu0 %v466_v34 }
 0x1f4   :  { %v465_v36 = vmul.f32 %v1035_v29, %v463_v35 }
 0x1f6   :  { %v467_v37 = vmul.f32 %v465_v36, %v465_v36 }
 0x1f8   :  { %470 = vadd.xlane.f32.xlu1 %v467_v37 }
 0x20f   :  { %v957_v38 = vpop.xlane.xlu1 %956 }
 0x210   :  { %v959_v39 = vmul.f32 0.03125, %v957_v38 }
 0x212   :  { %v961_v42 = vsub.f32 %v1283_v8, %v959_v39 }
 0x214   :  { %v1645_v49 = vmul.f32 %v1035_v29, %v961_v42 }
 0x216   :  { %v965_v55 = vmul.f32 %v1645_v49, %v1645_v49 }
 0x228   :  { %v816_v40 = vpop.xlane.xlu0 %815 }
 0x229   :  { %v818_v41 = vmul.f32 0.03125, %v816_v40 }
 0x22b   :  { %v820_v43 = vsub.f32 %v810_v19, %v818_v41 }
 0x22c   :  { %v814_v44 = vpop.xlane.xlu0 %813 }
 0x22d   :  { %v817_v45 = vmul.f32 0.03125, %v814_v44  ;;  %v1641_v46 = vmul.f32 %v1035_v29, %v820_v43 }
 0x22f   :  { %v819_v47 = vsub.f32 %v805_v22, %v817_v45  ;;  %v824_v48 = vmul.f32 %v1641_v46, %v1641_v46 }
 0x230   :  { %v955_v50 = vpop.xlane.xlu0 %954 }
 0x231   :  { %v958_v51 = vmul.f32 0.03125, %v955_v50  ;;  %827 = vadd.xlane.f32.xlu1 %v824_v48  ;;  %v821_v52 = vmul.f32 %v1035_v29, %v819_v47 }
 0x233   :  { %v960_v53 = vsub.f32 %v1280_v23, %v958_v51  ;;  %v823_v54 = vmul.f32 %v821_v52, %v821_v52 }
 0x235   :  { %825 = vadd.xlane.f32.xlu0 %v823_v54  ;;  %968 = vadd.xlane.f32.xlu1 %v965_v55  ;;  %v1649_v56 = vmul.f32 %v1035_v29, %v960_v53 }
 0x237   :  { %v964_v57 = vmul.f32 %v1649_v56, %v1649_v56 }
 0x239   :  { %966 = vadd.xlane.f32.xlu0 %v964_v57 }
 0x27b   :  { %v469_v58 = vpop.xlane.xlu0 %468 }
 0x27c   :  { %v472_v59 = vmul.f32 0.03125, %v469_v58 }
 0x27e   :  { %v474_v60 = vadd.f32 1e-05, %v472_v59 }
 0x280   :  { %1337 = vrsqrt.f32 %v474_v60 }
 0x281   :  { %v471_v61 = vpop.xlane.xlu1 %470 }
 0x282   :  { %v473_v62 = vmul.f32 0.03125, %v471_v61 }
 0x284   :  { %v475_v63 = vadd.f32 1e-05, %v473_v62 }
 0x286   :  { %1339 = vrsqrt.f32 %v475_v63 }
 0x28d   :  { %v1338_v0 = vpop.eup %1337 }
 0x28e   :  { %v478_v2 = vmul.f32 %v1338_v0, %v464_v31 }
 0x290   :  { %v486_v4 = vmul.f32 %v1036_v1, %v478_v2 }
 0x292   :  { %v494_v5 = vadd.f32 %v1659_v3, %v486_v4 }
 0x293   :  { %v1340_v6 = vpop.eup %1339 }
 0x294   :  { %v479_v7 = vmul.f32 %v1340_v6, %v465_v36  ;;  %496 = vst [vmem:[#allocation13] sm:$0xff] %v494_v5 }
 0x296   :  { %v487_v8 = vmul.f32 %v1036_v1, %v479_v7 }
 0x298   :  { %v495_v9 = vadd.f32 %v1659_v3, %v487_v8 }
 0x29a   :  { %497 = vst [vmem:[#allocation13 + $0x8] sm:$0xff] %v495_v9 }
 0x29b   :  { %1480 = shalt.err (!%p1477_p6)
}
 0x29c   :  { %995 = dma.vmem_to_hbm [thread:$0]  %s990_s11, 256, %s1696_s8, [#allocation4], %s1545_s23, %s1545_s23, %s1546_s24  }
 0x29d   :  { %s1557_s8 = smov [#allocation14]   ;;  %s1558_s14 = smov [#allocation16]  }
 0x29e   :  { %s1001_s13 = sshll.u32 %s1557_s8, 4  ;;  %s1013_s3 = sshll.u32 %s1558_s14, 4  ;;  %s1002_s13 = int_to_ptr.vmem [resolvable:$true] %s1001_s13  ;;  %s1014_s3 = int_to_ptr.vmem [resolvable:$true] %s1013_s3 }
 0x29f   :  { %s1489_s15 = scalar_lea.vmem %s1002_s13, 256  ;;  %p1494_p8 = scmp.lt.s32.totalorder %s1002_s13, %s1002_s13 }
 0x2a0   :  { %p1490_p7 = scmp.ne.s32.totalorder %s1002_s13, %s1489_s15  ;;  %p1495_p9 = scmp.lt.s32.totalorder %s1489_s15, %s1489_s15 }
 0x2a2   :  { %p1496_p10 = por %p1495_p9, %p1494_p8 }
 0x2a4   :  { %p1497_p11 = pnand %p1496_p10, %p1490_p7 }
 0x2ba   :  { %v828_v10 = vpop.xlane.xlu1 %827 }
 0x2bb   :  { %v830_v11 = vmul.f32 0.03125, %v828_v10 }
 0x2bd   :  { %v832_v12 = vadd.f32 1e-05, %v830_v11 }
 0x2be   :  { %v826_v13 = vpop.xlane.xlu0 %825  ;;  %v969_v14 = vpop.xlane.xlu1 %968 }
 0x2bf   :  { %1341 = vrsqrt.f32 %v832_v12  ;;  %v829_v15 = vmul.f32 0.03125, %v826_v13  ;;  %v971_v16 = vmul.f32 0.03125, %v969_v14 }
 0x2c1   :  { %v831_v17 = vadd.f32 1e-05, %v829_v15  ;;  %v973_v18 = vadd.f32 1e-05, %v971_v16 }
 0x2c2   :  { %v967_v19 = vpop.xlane.xlu0 %966 }
 0x2c3   :  { %1343 = vrsqrt.f32 %v831_v17  ;;  %v970_v20 = vmul.f32 0.03125, %v967_v19 }
 0x2c4   :  { %1345 = vrsqrt.f32 %v973_v18 }
 0x2c5   :  { %v972_v21 = vadd.f32 1e-05, %v970_v20 }
 0x2c7   :  { %1347 = vrsqrt.f32 %v972_v21 }
 0x2cc   :  { %v1342_v22 = vpop.eup %1341 }
 0x2cd   :  { %v836_v23 = vmul.f32 %v1342_v22, %v1641_v46 }
 0x2cf   :  { %v838_v24 = vmul.f32 %v1036_v1, %v836_v23 }
 0x2d0   :  { %v1344_v25 = vpop.eup %1343 }
 0x2d1   :  { %v1346_v26 = vpop.eup %1345  ;;  %v835_v27 = vmul.f32 %v1344_v25, %v821_v52  ;;  %v840_v28 = vadd.f32 %v1659_v3, %v838_v24 }
 0x2d2   :  { %v977_v29 = vmul.f32 %v1346_v26, %v1645_v49 }
 0x2d3   :  { %v837_v30 = vmul.f32 %v1036_v1, %v835_v27  ;;  %842 = vst [vmem:[#allocation14 + $0x8] sm:$0xff] %v840_v28 }
 0x2d4   :  { %v1348_v31 = vpop.eup %1347  ;;  %v979_v32 = vmul.f32 %v1036_v1, %v977_v29 }
 0x2d5   :  { %v839_v33 = vadd.f32 %v1659_v3, %v837_v30  ;;  %v976_v34 = vmul.f32 %v1348_v31, %v1649_v56 }
 0x2d6   :  { %v981_v35 = vadd.f32 %v1659_v3, %v979_v32 }
 0x2d7   :  { %841 = vst [vmem:[#allocation14] sm:$0xff] %v839_v33  ;;  %v978_v36 = vmul.f32 %v1036_v1, %v976_v34 }
 0x2d8   :  { %1500 = shalt.err (!%p1497_p11)
}
 0x2d9   :  { %1007 = dma.vmem_to_hbm [thread:$0]  %s1002_s13, 256, %s1697_s9, [#allocation15], %s1545_s23, %s1545_s23, %s1546_s24   ;;  %983 = vst [vmem:[#allocation16 + $0x8] sm:$0xff] %v981_v35  ;;  %v980_v37 = vadd.f32 %v1659_v3, %v978_v36 }
 0x2da   :  { %s1509_s18 = scalar_lea.vmem %s1014_s3, 256  ;;  %p1514_p13 = scmp.lt.s32.totalorder %s1014_s3, %s1014_s3 }
 0x2db   :  { %982 = vst [vmem:[#allocation16] sm:$0xff] %v980_v37  ;;  %p1510_p12 = scmp.ne.s32.totalorder %s1014_s3, %s1509_s18  ;;  %p1515_p0 = scmp.lt.s32.totalorder %s1509_s18, %s1509_s18 }
 0x2dd   :  { %p1516_p1 = por %p1515_p0, %p1514_p13 }
 0x2df   :  { %p1517_p2 = pnand %p1516_p1, %p1510_p12 }
 0x2e1   :  { %1520 = shalt.err (!%p1517_p2)
}
 0x2e2   :  { %1019 = dma.vmem_to_hbm [thread:$0]  %s1014_s3, 256, %s1698_s10, [#allocation15], %s1545_s23, %s1545_s23, %s1546_s24  }
 0x2e3   :  { %1537 = dma.done.wait [#allocation4], 256  }
 0x2e4   :  { %1538 = vsyncadd [#allocation4], 4294967040 }
 0x2e5   :  { %1539 = dma.done.wait [#allocation15], 512  }
 0x2e6   :  { %1540 = vsyncadd [#allocation15], 4294966784 }
 0x2e7   :  { %1029 = vsyncpa [#allocation3], 1 }
 0x2e8   :  { %1030 = vsyncpa [#allocation6], 1 }
 0x2e9   :  { %1031 = vsyncpa [#allocation9], 1 }
 0x2ea   :  { %1032 = vsyncpa [#allocation12], 1 }
 0x2eb   :  { %1033 = vsyncpa [#allocation4], 1 }
 0x2ec   :  { %1034 = vsyncpa [#allocation15], 1 }

</bundles_post_ra>
